<compile_context>
chip_gen: v7x
topology: tpu7x:2x2x1
jax: 0.10.0
libtpu: 0.0.40
codegen_flags: <defaults>
</compile_context>

<pallas_src>
import functools

import jax
import jax.numpy as jnp
from jax.experimental import pallas as pl
from jax.experimental.pallas import tpu as pltpu

_LANE = 128
_TARGET_BLOCK_BYTES = 4 * 1024 * 1024   # ~4 MiB input block per grid step


# ----------------------------- Pallas kernel ------------------------------ #
def shuffle_ave_kernel(n_filts, cpg, x_ref, o_ref):
    # x_ref: (TB, C, TILE)       -- channels on sublanes, flat spatial on lanes
    # o_ref: (TB, n_filts, TILE)
    tb, c, t = x_ref.shape
    x = x_ref[...].astype(jnp.float32)        # one dense whole-block load, f32 accum
    inv = jnp.float32(1.0 / cpg)

    if cpg == n_filts:
        # src(P, Q) = Q*cpg + P : shuffle + mean collapses to a strided group
        # reduction over the channel (sublane) axis -- no permutation needed.
        out = x.reshape(tb, cpg, n_filts, t).sum(axis=1) * inv
        o_ref[...] = out.astype(o_ref.dtype)  # one dense whole-block store
    else:
        # General static shuffle: accumulate full-width value slabs per output
        # channel.  Stores land in the VMEM output block; the HBM writeback is
        # still one dense block DMA per grid step.
        for p in range(n_filts):
            acc = jnp.zeros((tb, 1, t), jnp.float32)
            for q in range(cpg):
                cprime = p * cpg + q                                  # shuffled idx
                src = (cprime % n_filts) * cpg + (cprime // n_filts)  # original ch
                acc = acc + x[:, src:src + 1, :]
            o_ref[:, p:p + 1, :] = (acc * inv).astype(o_ref.dtype)


# ----------------------------- block selection ----------------------------- #
def _pick_blocks(b, c, hw_pad, itemsize, target_bytes=_TARGET_BLOCK_BYTES):
    """Choose (batch_block, spatial_tile): ~target_bytes input per grid step."""
    tiles = [t for t in range(_LANE, hw_pad + 1, _LANE) if hw_pad % t == 0]
    tile = tiles[0]
    for t in tiles:                           # largest lane-dense tile under budget
        if c * t * itemsize <= target_bytes:
            tile = t
    tb = 1
    if tile == hw_pad:                        # spatial fits: block batches too
        for cand in range(1, b + 1):
            if b % cand == 0 and cand * c * hw_pad * itemsize <= target_bytes:
                tb = cand
    # Keep >= 2 grid steps when possible (v7x: 2 TensorCores share the grid).
    if (b // tb) * (hw_pad // tile) < 2:
        if tb > 1:
            tb = max(d for d in range(1, b) if b % d == 0 and b // d >= 2)
        elif hw_pad // tile < 2 and len(tiles) > 1:
            tile = max(t for t in tiles if hw_pad // t >= 2)
    return tb, tile


# --------------------------------- wrapper --------------------------------- #
@functools.partial(jax.jit, static_argnames=("n_filts",))
def channel_shuffle_ave(x_nchw, n_filts):
    b, c, h, w = x_nchw.shape
    assert c % n_filts == 0, "num_channels must be divisible by n_filts"
    cpg = c // n_filts
    hw = h * w
    hw_pad = ((hw + _LANE - 1) // _LANE) * _LANE
    itemsize = jnp.dtype(x_nchw.dtype).itemsize

    x = x_nchw.reshape(b, c, hw)              # spatial -> lanes (free view)
    if hw_pad != hw:
        # Pad lanes to a multiple of 128: keeps DMA unmasked / lane-dense and
        # allows tiling; padded lanes are sliced away after the kernel.
        x = jnp.pad(x, ((0, 0), (0, 0), (0, hw_pad - hw)))

    tb, tile = _pick_blocks(b, c, hw_pad, itemsize)
    grid = (b // tb, hw_pad // tile)

    in_blk = tb * c * tile * itemsize
    out_blk = tb * n_filts * tile * itemsize
    # double-buffered in/out blocks + one f32 working copy + headroom,
    # capped safely below v7x's 64 MiB physical VMEM.
    vmem_limit = int(
        min(48 << 20,
            max(16 << 20,
                2 * (in_blk + out_blk) + tb * (c + n_filts) * tile * 4 + (4 << 20))))

    out = pl.pallas_call(
        functools.partial(shuffle_ave_kernel, n_filts, cpg),
        out_shape=jax.ShapeDtypeStruct((b, n_filts, hw_pad), x.dtype),
        grid=grid,
        in_specs=[pl.BlockSpec((tb, c, tile), lambda i, j: (i, 0, j))],
        out_specs=pl.BlockSpec((tb, n_filts, tile), lambda i, j: (i, 0, j)),
        compiler_params=pltpu.CompilerParams(
            dimension_semantics=("parallel", "parallel"),
            vmem_limit_bytes=vmem_limit,
        ),
    )(x)

    if hw_pad != hw:
        out = out[:, :, :hw]
    return out.reshape(b, n_filts, h, w)


# ---------------------------- pure-JAX reference --------------------------- #
def channel_shuffle_ave_reference(x, n_filts):
    b, c, h, w = x.shape
    cpg = c // n_filts
    y = x.reshape(b, n_filts, cpg, h, w)
    y = jnp.transpose(y, (0, 2, 1, 3, 4))     # torch.transpose(x, 1, 2)
    y = y.reshape(b, -1, h, w)                # channel shuffle
    y = y.reshape(b, n_filts, cpg, h, w)
    y = jnp.mean(y, axis=2)                   # group average
    return y.reshape(b, -1, h, w)


if __name__ == "__main__":
    key = jax.random.PRNGKey(0)
    configs = [
        ((2, 16, 16, 16), 4),   # cpg == n_filts, hw multiple of 128 (primary)
        ((2, 16, 10, 10), 4),   # cpg == n_filts, hw=100 -> padded to 128
        ((2, 24, 8, 8), 4),     # cpg=6 != n_filts: general shuffle path
    ]
    for idx, (shape, n_filts) in enumerate(configs):
        key, sub = jax.random.split(key)
        x = jax.random.normal(sub, shape, jnp.float32)       # NCHW like PyTorch
        out = jax.block_until_ready(channel_shuffle_ave(x, n_filts=n_filts))
        ref = channel_shuffle_ave_reference(x, n_filts)
        assert out.shape == ref.shape, (out.shape, ref.shape)
        err = float(jnp.max(jnp.abs(out - ref)))
        assert jnp.allclose(out, ref, atol=1e-5, rtol=1e-5), \
            f"config {idx}: max |err| = {err}"
    print("KERNEL_OK")
</pallas_src>

<mosaic_0001>
module attributes {stable_mosaic.version = 11 : i64} {
  func.func @shuffle_ave_kernel(%arg0: i32, %arg1: i32, %arg2: memref<1x16x256xf32, #tpu.memory_space<vmem>>, %arg3: memref<1x4x256xf32, #tpu.memory_space<vmem>>) attributes {dimension_semantics = [#tpu.dimension_semantics<parallel>, #tpu.dimension_semantics<parallel>], iteration_bounds = array<i64: 2, 1>, scalar_prefetch = 0 : i64, scratch_operands = 0 : i64, tpu.core_type = #tpu.core_type<tc>, window_params = [{transform_indices = @transform_0, window_bounds = array<i64: 1, 16, 256>}, {transform_indices = @transform_1, window_bounds = array<i64: 1, 4, 256>}]} {
    %c0 = arith.constant 0 : index
    %c0_0 = arith.constant 0 : index
    %c0_1 = arith.constant 0 : index
    %0 = vector.load %arg2[%c0, %c0_0, %c0_1] : memref<1x16x256xf32, #tpu.memory_space<vmem>>, vector<1x16x256xf32>
    %1 = vector.shape_cast %0 : vector<1x16x256xf32> to vector<1x4x4x256xf32>
    %cst = arith.constant dense<0.000000e+00> : vector<1x4x256xf32>
    %2 = vector.multi_reduction <add>, %1, %cst [1] : vector<1x4x4x256xf32> to vector<1x4x256xf32>
    %cst_2 = arith.constant 2.500000e-01 : f32
    %3 = vector.broadcast %cst_2 : f32 to vector<1x4x256xf32>
    %4 = arith.mulf %2, %3 : vector<1x4x256xf32>
    %c0_3 = arith.constant 0 : index
    %c0_4 = arith.constant 0 : index
    %c0_5 = arith.constant 0 : index
    %5 = vector.load %arg3[%c0_3, %c0_4, %c0_5] : memref<1x4x256xf32, #tpu.memory_space<vmem>>, vector<1x4x256xf32>
    tpu.vector_store %arg3[%c0_3, %c0_4, %c0_5], %4 {strides = array<i32>} : memref<1x4x256xf32, #tpu.memory_space<vmem>>, vector<1x4x256xf32>,
    return
  }
  func.func @transform_0(%arg0: i32, %arg1: i32) -> (i32, i32, i32) {
    %c0_i32 = arith.constant 0 : i32
    %c0_i32_0 = arith.constant 0 : i32
    return %arg0, %c0_i32, %arg1 : i32, i32, i32
  }
  func.func @transform_1(%arg0: i32, %arg1: i32) -> (i32, i32, i32) {
    %c0_i32 = arith.constant 0 : i32
    %c0_i32_0 = arith.constant 0 : i32
    return %arg0, %c0_i32, %arg1 : i32, i32, i32
  }
}

</mosaic_0001>

<bundles_post_ra>
// kernel: channel_shuffle_ave.1
= control target key start
LH: loop header
LB: loop body
LE: loop exit
PB: predicated region body
PF: predicated region fallthrough
CT: control target
= control target key end

     0   :  { %s372_s6 = smov 0   ;;  %s374_s7 = smov 0   ;;  %s417_s0 = inlined_call_operand.vmem [shape: f32[2,16,256], index: 0, kind: input, shape index: {}]   ;;  %s418_s1 = inlined_call_operand.vmem [shape: f32[2,4,256], index: 1, kind: output, shape index: {}]  }
   0x1   :  { %s376_s8 = smov 0  }
   0x2 LB: > { %s23_s9 = sadd.s32 1, %s356_s7  ;;  %p293_p0 = scmp.ge.s32.totalorder %s360_s8, 1  ;;  %s360_s8 = sphi %s376_s8, %s11_s8   ;;  %s356_s7 = sphi %s374_s7, %s420_s7   ;;  %s352_s6 = sphi %s372_s6, %s419_s6  }
   0x3   : > { %p25_p1 = scmp.ge.s32.totalorder %s23_s9, 2  ;;  %p108_p2 = scmp.lt.s32.totalorder %s360_s8, 3 }
   0x5   : > { %s422_s9 = smov (%p25_p1, %s23_s9), 0  ;;  %p109_p3 = pnand %p293_p0, %p108_p2 }
   0x6   : > { %p137_p4 = scmp.lt.s32.totalorder (!%p109_p3), %s352_s6, 1  ;;  %vm180_vm0 = vcmask (!%p109_p3), 1043456  }
   0x7   : > { %112 = sbr.rel (%p109_p3) target bundleno = 32 (0x20), region = 24 }
   0xe   : > { %s424_s6 = smov (!%p137_p4, %s352_s6), 1 }
   0xf   : > { %s304_s10 = sshll.u32 %s424_s6, 5  ;;  %s305_s14 = sshll.u32 %s424_s6, 3 }
  0x10   : > { %s144_s13 = scalar_lea.vmem %s417_s0, %s304_s10  ;;  %s154_s17 = scalar_lea.vmem %s418_s1, %s305_s14 }
  0x11   : > { %v156_v0 = vld [vmem:[%s144_s13] sm:$0xff]  ;;  %v157_v1 = vld [vmem:[%s144_s13 + $0x8] sm:$0xff]  ;;  %v158_v2 = vld [vmem:[%s144_s13 + $0x10] sm:$0xff] }
  0x12   : > { %v159_v3 = vld [vmem:[%s144_s13 + $0x18] sm:$0xff]  ;;  %v164_v4 = vcombine.low %v156_v0, %v157_v1  ;;  %v165_v5 = vcombine.high %v156_v0, %v157_v1  ;;  %v298_v6 = vcombine.low %v157_v1, %v157_v1  ;;  %v299_v7 = vcombine.high %v157_v1, %v157_v1 }
  0x13   : > { %v166_v8 = vcombine.low %v158_v2, %v159_v3  ;;  %v167_v9 = vcombine.high %v158_v2, %v159_v3  ;;  %v300_v10 = vcombine.low %v159_v3, %v159_v3  ;;  %v301_v11 = vcombine.high %v159_v3, %v159_v3 }
  0x14   : > { %v181_v12 = vsel %vm180_vm0, %v164_v4, 0.0  ;;  %v182_v13 = vsel %vm180_vm0, %v165_v5, 0.0  ;;  %v188_v14 = vsel %vm180_vm0, %v298_v6, 0.0  ;;  %v189_v15 = vsel %vm180_vm0, %v299_v7, 0.0 }
  0x15   : > { %v183_v16 = vadd.f32 %v182_v13, %v181_v12  ;;  %v184_v17 = vsel %vm180_vm0, %v166_v8, 0.0  ;;  %v190_v18 = vadd.f32 %v189_v15, %v188_v14  ;;  %v186_v19 = vsel %vm180_vm0, %v167_v9, 0.0 }
  0x16   : > { %v191_v20 = vsel %vm180_vm0, %v300_v10, 0.0  ;;  %v193_v21 = vsel %vm180_vm0, %v301_v11, 0.0 }
  0x17   : > { %v185_v22 = vadd.f32 %v184_v17, %v183_v16  ;;  %v192_v23 = vadd.f32 %v191_v20, %v190_v18 }
  0x19   : > { %v187_v24 = vadd.f32 %v186_v19, %v185_v22  ;;  %v194_v25 = vadd.f32 %v193_v21, %v192_v23 }
  0x1b   : > { %v195_v26 = vmul.f32 0.25, %v187_v24  ;;  %v196_v27 = vmul.f32 0.25, %v194_v25 }
  0x1d   : > { %v199_v28 = vcombine.low %v195_v26, %v196_v27 }
  0x1f   : > { %201 = vst [vmem:[%s154_s17] sm:$0xff] %v199_v28 }
  0x20 PF: > { %s11_s8 = sadd.s32 1, %s360_s8   ;;  %s419_s6 = smov %s356_s7 }
  0x21   : > { %p8_p5 = scmp.ge.s32.totalorder %s11_s8, 4   ;;  %s420_s7 = smov %s422_s9 }
  0x23   :  { %10 = sbr.rel (!%p8_p5) target bundleno = 2 (0x2), region = 54 }

</bundles_post_ra>
